<compile_context>
chip_gen: v7x
topology: tpu7x:2x2x1
jax: 0.10.0
libtpu: 0.0.40
codegen_flags: <defaults>
</compile_context>

<pallas_src>
import functools
import math

import jax
import jax.numpy as jnp
from jax.experimental import pallas as pl
from jax.experimental.pallas import tpu as pltpu

_LANE = 128  # vreg lane width


# --------------------------------- forward -----------------------------------
def surrogate_forward(embeddings, mean, log_std):
    """Matches IsotropicGaussianSurrogateWithMean.forward: embeddings are ignored,
    returns {'mean': (1,), 'std': exp(log_std) (1,)}.  Plain JAX on purpose: a Pallas
    launch for a single scalar exp has nothing to amortize its fixed cost."""
    del embeddings  # the PyTorch module ignores the embeddings in _forward_impl
    return {
        "mean": mean.reshape(1).astype(jnp.float32),
        "std": jnp.exp(log_std.reshape(1).astype(jnp.float32)),
    }


# ------------------------------- log_pdf kernel -------------------------------
def _log_pdf_kernel(scalars_ref, noisy_ref, cand_ref, out_ref, acc_ref, *, lane):
    # scalars_ref : SMEM (3,) f32 = [mean, 1/(2*var), norm_const]
    # noisy_ref   : VMEM (tb, td)       (input dtype; upcast below)
    # cand_ref    : VMEM (tb, tc, td)   (input dtype; upcast below)
    # out_ref     : VMEM (tb, tc) f32
    # acc_ref     : VMEM f32 scratch carried across the d (k) grid axis:
    #               (tb, tc, lane) when lane is not None (aligned fast path),
    #               (tb, tc)       when lane is None (td not a 128-multiple; grid_d==1).
    k = pl.program_id(2)

    @pl.when(k == 0)
    def _():
        acc_ref[...] = jnp.zeros_like(acc_ref)

    mean = scalars_ref[0]
    # Hoist the mean shift out of the (tb, tc, td) broadcast: one (tb, td) subtract.
    noisy = noisy_ref[...].astype(jnp.float32) - mean          # (tb, td)
    cand = cand_ref[...].astype(jnp.float32)                   # (tb, tc, td)
    td = cand.shape[-1]

    if lane is None:
        # Fallback path (td not a multiple of 128 -> single k step): direct reduce.
        r = noisy[:, None, :] - cand
        acc_ref[...] += jnp.sum(r * r, axis=-1)
    else:
        # Lane-resident accumulation over aligned 128-lane chunks: pure VPU elementwise
        # work per grid step; the cross-lane collapse is deferred to the finalize.
        acc = acc_ref[...]                                      # (tb, tc, lane)
        for s in range(td // lane):                             # static unroll (<= 4)
            lo, hi = s * lane, (s + 1) * lane
            r = noisy[:, None, lo:hi] - cand[:, :, lo:hi]       # (tb, tc, lane)
            acc = acc + r * r
        acc_ref[...] = acc

    @pl.when(k == pl.num_programs(2) - 1)
    def _():
        inv_two_var = scalars_ref[1]
        norm_const = scalars_ref[2]
        if lane is None:
            sq = acc_ref[...]                                   # (tb, tc)
        else:
            sq = jnp.sum(acc_ref[...], axis=-1)                 # one XLU reduce / tile
        out_ref[...] = (norm_const - sq * inv_two_var).astype(out_ref.dtype)


def _pick_tile(dim, mult, cap):
    """Largest tile t <= cap with t % mult == 0 and dim % t == 0; otherwise the full
    dim (full-extent blocks are always legal w.r.t. the (8,128) tiling constraint)."""
    if dim <= cap:
        return dim
    t = (cap // mult) * mult
    while t >= mult:
        if dim % t == 0:
            return t
        t -= mult
    return dim


def surrogate_log_pdf(noisy_embeddings, candidate_embeddings, noise_stats,
                      *, max_tb=8, max_tc=256, max_td=512):
    """Matches IsotropicGaussianSurrogateWithMean.log_pdf for
    noisy_embeddings [B, d], candidate_embeddings [B, C, d] -> [B, C] (float32).

    Default tile caps keep the double-buffered candidate block at <= ~8 MiB (f32) /
    ~4 MiB (bf16): inside v5e's 16 MiB and v7x's 32 MiB default scoped-VMEM budgets,
    while big enough to amortize the ~0.35 us per-grid-step overhead.
    """
    B, d = noisy_embeddings.shape
    Bc, C, dc = candidate_embeddings.shape
    assert B == Bc and d == dc

    # Precompute the per-call scalars once (not per grid step) and ship them via SMEM.
    mean = noise_stats["mean"].reshape(()).astype(jnp.float32)
    std = noise_stats["std"].reshape(()).astype(jnp.float32)
    var = std * std
    inv_two_var = 1.0 / (2.0 * var)
    norm_const = -(d / 2.0) * jnp.log(2.0 * math.pi * var)
    scalars = jnp.stack([mean, inv_two_var, norm_const]).astype(jnp.float32)   # (3,)

    # (8,128) constraints: tb multiple of 8 (noisy/out sublane dim), tc multiple of 128
    # (out lane dim) and td multiple of 128 (cand/noisy lane dim) -- or the full extent.
    tb = _pick_tile(B, 8, max_tb)
    tc = _pick_tile(C, 128, max_tc)
    td = _pick_tile(d, 128, max_td)
    grid = (B // tb, C // tc, d // td)

    # Fast path: td is a multiple of 128 -> lane-resident (tb, tc, 128) accumulator.
    # Otherwise td == d (single k step, _pick_tile fallback) -> direct (tb, tc) acc.
    lane = _LANE if td % _LANE == 0 else None
    acc_shape = (tb, tc, _LANE) if lane is not None else (tb, tc)
    kernel = functools.partial(_log_pdf_kernel, lane=lane)

    return pl.pallas_call(
        kernel,
        out_shape=jax.ShapeDtypeStruct((B, C), jnp.float32),
        grid_spec=pltpu.PrefetchScalarGridSpec(
            num_scalar_prefetch=0,
            grid=grid,
            in_specs=[
                pl.BlockSpec(memory_space=pltpu.MemorySpace.SMEM),        # scalars
                pl.BlockSpec((tb, td), lambda i, j, k: (i, k)),           # noisy
                pl.BlockSpec((tb, tc, td), lambda i, j, k: (i, j, k)),    # candidates
            ],
            out_specs=pl.BlockSpec((tb, tc), lambda i, j, k: (i, j)),
            scratch_shapes=[pltpu.VMEM(acc_shape, jnp.float32)],
        ),
        compiler_params=pltpu.CompilerParams(
            dimension_semantics=("parallel", "parallel", "arbitrary")),
    )(scalars, noisy_embeddings, candidate_embeddings)


# ----------------------------------- main -------------------------------------
if __name__ == "__main__":
    key = jax.random.PRNGKey(0)
    k1, k2, k3 = jax.random.split(key, 3)

    B, Z, C, d = 16, 3, 16, 256

    # Deterministic parameter init, identical to the module's __init__ with
    # initial_std=None:  mean = 0.0,  log_std = log(0.3).
    mean_param = jnp.zeros((1,), dtype=jnp.float32)
    log_std_param = jnp.log(jnp.full((1,), 0.3, dtype=jnp.float32))

    # Forward pass (embeddings [B, Z, C, d] accepted but ignored, as in PyTorch).
    embeddings = jax.random.normal(k1, (B, Z, C, d), dtype=jnp.float32)
    stats = surrogate_forward(embeddings, mean_param, log_std_param)
    jax.block_until_ready(stats)
    assert stats["mean"].shape == (1,) and stats["std"].shape == (1,)
    assert jnp.allclose(stats["mean"], mean_param, atol=1e-6)
    assert jnp.allclose(stats["std"], jnp.exp(log_std_param), atol=1e-6)

    noisy = jax.random.normal(k2, (B, d), dtype=jnp.float32)
    candidates = jax.random.normal(k3, (B, C, d), dtype=jnp.float32)

    def ref_log_pdf(noisy_f32, cand_f32, stats_):
        var_ = stats_["std"][0] ** 2
        res_ = noisy_f32[:, None, :] - cand_f32 - stats_["mean"][0]
        sq_ = jnp.sum(res_ * res_, axis=-1)
        return -(d / 2.0) * jnp.log(2.0 * jnp.pi * var_) - sq_ / (2.0 * var_)

    # f32 inputs, small tile caps so the (B-tiled, d-reduction) grid and the
    # accumulator init/finalize path are actually exercised: grid = (2, 1, 2).
    logp = surrogate_log_pdf(noisy, candidates, stats,
                             max_tb=8, max_tc=128, max_td=128)
    jax.block_until_ready(logp)
    ref = ref_log_pdf(noisy, candidates, stats)
    assert logp.shape == (B, C)
    assert jnp.allclose(logp, ref, atol=1e-3, rtol=1e-4)

    # bf16 inputs stay bf16 in HBM (half the DMA traffic on this mem-bound kernel);
    # the kernel upcasts to f32 before the squared-residual accumulation.  Default
    # (production) tiles -> td=256 exercises the multi-chunk lane-accumulator path.
    noisy_bf = noisy.astype(jnp.bfloat16)
    cand_bf = candidates.astype(jnp.bfloat16)
    logp_bf = surrogate_log_pdf(noisy_bf, cand_bf, stats)
    jax.block_until_ready(logp_bf)
    ref_bf = ref_log_pdf(noisy_bf.astype(jnp.float32), cand_bf.astype(jnp.float32), stats)
    assert logp_bf.shape == (B, C)
    assert jnp.allclose(logp_bf, ref_bf, atol=1e-2, rtol=1e-4)

    print("KERNEL_OK")
</pallas_src>

<mosaic_0001>
module attributes {stable_mosaic.version = 11 : i64} {
  func.func @_log_pdf_kernel(%arg0: i32, %arg1: i32, %arg2: i32, %arg3: memref<3xf32, #tpu.memory_space<smem>>, %arg4: memref<8x128xf32, #tpu.memory_space<vmem>>, %arg5: memref<8x16x128xf32, #tpu.memory_space<vmem>>, %arg6: memref<8x16xf32, #tpu.memory_space<vmem>>, %arg7: memref<8x16x128xf32, #tpu.memory_space<vmem>>) attributes {dimension_semantics = [#tpu.dimension_semantics<parallel>, #tpu.dimension_semantics<parallel>, #tpu.dimension_semantics<arbitrary>], iteration_bounds = array<i64: 2, 1, 2>, scalar_prefetch = 0 : i64, scratch_operands = 1 : i64, tpu.core_type = #tpu.core_type<tc>, window_params = [{transform_indices = @transform_0, window_bounds = array<i64: 3>}, {transform_indices = @transform_1, window_bounds = array<i64: 8, 128>}, {transform_indices = @transform_2, window_bounds = array<i64: 8, 16, 128>}, {transform_indices = @transform_3, window_bounds = array<i64: 8, 16>}]} {
    %c0_i32 = arith.constant 0 : i32
    %0 = arith.cmpi eq, %arg2, %c0_i32 : i32
    %1 = arith.extui %0 : i1 to i32
    %c0_i32_0 = arith.constant 0 : i32
    %2 = arith.cmpi ne, %1, %c0_i32_0 : i32
    scf.if %2 {
      %cst = arith.constant 0.000000e+00 : f32
      %18 = vector.broadcast %cst : f32 to vector<8x16x128xf32>
      %c0_13 = arith.constant 0 : index
      %c0_14 = arith.constant 0 : index
      %c0_15 = arith.constant 0 : index
      %19 = vector.load %arg7[%c0_13, %c0_14, %c0_15] : memref<8x16x128xf32, #tpu.memory_space<vmem>>, vector<8x16x128xf32>
      tpu.vector_store %arg7[%c0_13, %c0_14, %c0_15], %18 {strides = array<i32>} : memref<8x16x128xf32, #tpu.memory_space<vmem>>, vector<8x16x128xf32>,
    } else {
    }
    %c0 = arith.constant 0 : index
    %3 = memref.load %arg3[%c0] : memref<3xf32, #tpu.memory_space<smem>>
    %c0_1 = arith.constant 0 : index
    %c0_2 = arith.constant 0 : index
    %4 = vector.load %arg4[%c0_1, %c0_2] : memref<8x128xf32, #tpu.memory_space<vmem>>, vector<8x128xf32>
    %5 = vector.broadcast %3 : f32 to vector<8x128xf32>
    %6 = arith.subf %4, %5 : vector<8x128xf32>
    %c0_3 = arith.constant 0 : index
    %c0_4 = arith.constant 0 : index
    %c0_5 = arith.constant 0 : index
    %7 = vector.load %arg5[%c0_3, %c0_4, %c0_5] : memref<8x16x128xf32, #tpu.memory_space<vmem>>, vector<8x16x128xf32>
    %c0_6 = arith.constant 0 : index
    %c0_7 = arith.constant 0 : index
    %c0_8 = arith.constant 0 : index
    %8 = vector.load %arg7[%c0_6, %c0_7, %c0_8] : memref<8x16x128xf32, #tpu.memory_space<vmem>>, vector<8x16x128xf32>
    %9 = vector.shape_cast %6 : vector<8x128xf32> to vector<8x1x128xf32>
    %10 = vector.broadcast %9 : vector<8x1x128xf32> to vector<8x16x128xf32>
    %11 = arith.subf %10, %7 : vector<8x16x128xf32>
    %12 = arith.mulf %11, %11 : vector<8x16x128xf32>
    %13 = arith.addf %8, %12 : vector<8x16x128xf32>
    %c0_9 = arith.constant 0 : index
    %c0_10 = arith.constant 0 : index
    %c0_11 = arith.constant 0 : index
    %14 = vector.load %arg7[%c0_9, %c0_10, %c0_11] : memref<8x16x128xf32, #tpu.memory_space<vmem>>, vector<8x16x128xf32>
    tpu.vector_store %arg7[%c0_9, %c0_10, %c0_11], %13 {strides = array<i32>} : memref<8x16x128xf32, #tpu.memory_space<vmem>>, vector<8x16x128xf32>,
    %c1_i32 = arith.constant 1 : i32
    %15 = arith.cmpi eq, %arg2, %c1_i32 : i32
    %16 = arith.extui %15 : i1 to i32
    %c0_i32_12 = arith.constant 0 : i32
    %17 = arith.cmpi ne, %16, %c0_i32_12 : i32
    scf.if %17 {
      %c1 = arith.constant 1 : index
      %18 = memref.load %arg3[%c1] : memref<3xf32, #tpu.memory_space<smem>>
      %c2 = arith.constant 2 : index
      %19 = memref.load %arg3[%c2] : memref<3xf32, #tpu.memory_space<smem>>
      %c0_13 = arith.constant 0 : index
      %c0_14 = arith.constant 0 : index
      %c0_15 = arith.constant 0 : index
      %20 = vector.load %arg7[%c0_13, %c0_14, %c0_15] : memref<8x16x128xf32, #tpu.memory_space<vmem>>, vector<8x16x128xf32>
      %cst = arith.constant dense<0.000000e+00> : vector<8x16xf32>
      %21 = vector.multi_reduction <add>, %20, %cst [2] : vector<8x16x128xf32> to vector<8x16xf32>
      %22 = vector.broadcast %18 : f32 to vector<8x16xf32>
      %23 = arith.mulf %21, %22 : vector<8x16xf32>
      %24 = vector.broadcast %19 : f32 to vector<8x16xf32>
      %25 = arith.subf %24, %23 : vector<8x16xf32>
      %c0_16 = arith.constant 0 : index
      %c0_17 = arith.constant 0 : index
      %26 = vector.load %arg6[%c0_16, %c0_17] : memref<8x16xf32, #tpu.memory_space<vmem>>, vector<8x16xf32>
      tpu.vector_store %arg6[%c0_16, %c0_17], %25 {strides = array<i32>} : memref<8x16xf32, #tpu.memory_space<vmem>>, vector<8x16xf32>,
    } else {
    }
    return
  }
  func.func @transform_0(%arg0: i32, %arg1: i32, %arg2: i32) -> i32 {
    %c0_i32 = arith.constant 0 : i32
    %c0_i32_0 = arith.constant 0 : i32
    return %c0_i32 : i32
  }
  func.func @transform_1(%arg0: i32, %arg1: i32, %arg2: i32) -> (i32, i32) {
    %c0_i32 = arith.constant 0 : i32
    return %arg0, %arg2 : i32, i32
  }
  func.func @transform_2(%arg0: i32, %arg1: i32, %arg2: i32) -> (i32, i32, i32) {
    %c0_i32 = arith.constant 0 : i32
    return %arg0, %arg1, %arg2 : i32, i32, i32
  }
  func.func @transform_3(%arg0: i32, %arg1: i32, %arg2: i32) -> (i32, i32) {
    %c0_i32 = arith.constant 0 : i32
    return %arg0, %arg1 : i32, i32
  }
}

</mosaic_0001>

<bundles_post_ra>
// kernel: tpu_custom_call.1
= control target key start
LH: loop header
LB: loop body
LE: loop exit
PB: predicated region body
PF: predicated region fallthrough
CT: control target
= control target key end

     0   :  { %s1636_s0 = inlined_call_operand.hbm [shape: f32[3], index: 0, kind: input, shape index: {}]   ;;  %s1637_s1 = inlined_call_operand.hbm [shape: f32[16,256], index: 1, kind: input, shape index: {}]   ;;  %s1638_s2 = inlined_call_operand.hbm [shape: f32[16,16,256], index: 2, kind: input, shape index: {}]   ;;  %s1639_s3 = inlined_call_operand.hbm [shape: f32[16,16], index: 3, kind: output, shape index: {}]  }
   0x1   :  { %1651 = sst [smem:[#allocation20_spill]] %s1636_s0 }
   0x2   :  { %1652 = sst [smem:[#allocation21_spill]] %s1637_s1 }
   0x3   :  { %1653 = sst [smem:[#allocation22_spill]] %s1639_s3 }
   0x4   :  { %8 = vsyncpa [#allocation6], 0 }
   0x5   :  { %9 = vsyncpa [#allocation4], 0 }
   0x6   :  { %11 = vsyncpa [#allocation4 + $0x1], 0 }
   0x7   :  { %12 = vsyncpa [#allocation9], 0 }
   0x8   :  { %14 = vsyncpa [#allocation9 + $0x1], 0 }
   0x9   :  { %15 = vsyncpa [#allocation5], 0 }
   0xa   :  { %17 = vsyncpa [#allocation5 + $0x1], 0  ;;  %s1205_s12 = smov 0   ;;  %s1207_s13 = smov 0  }
   0xb   :  { %s1209_s14 = smov 0   ;;  %s1211_s15 = smov 0  }
   0xc   :  { %s1213_s16 = smov 0   ;;  %s1215_s17 = smov 0  }
   0xd   :  { %s1217_s18 = smov 0   ;;  %s1219_s19 = smov 0  }
   0xe   :  { %s1221_s20 = smov 0   ;;  %s1223_s21 = smov 0  }
   0xf   :  { %s1225_s22 = smov 0  }
  0x10 LB: > { %1654 = sst [smem:[#allocation15_spill]] %s1134_s12  ;;  %s822_s23 = sadd.s32 4294967295, %s1174_s22   ;;  %s1174_s22 = sphi %s1225_s22, %s23_s22   ;;  %s1170_s21 = sphi %s1223_s21, %s1692_s21   ;;  %s1166_s20 = sphi %s1221_s20, %s1691_s20   ;;  %s1162_s19 = sphi %s1219_s19, %s1690_s19   ;;  %s1158_s18 = sphi %s1217_s18, %s1689_s18   ;;  %s1154_s17 = sphi %s1215_s17, %s1688_s17   ;;  %s1150_s16 = sphi %s1213_s16, %s1687_s16   ;;  %s1146_s15 = sphi %s1211_s15, %s1686_s15   ;;  %s1142_s14 = sphi %s1209_s14, %s1685_s14   ;;  %s1138_s13 = sphi %s1207_s13, %s1684_s13   ;;  %s1134_s12 = sphi %s1205_s12, %s1683_s12  }
  0x11   : > { %s823_s24 = sadd.s32 4294967294, %s1174_s22   ;;  %p85_p1 = scmp.ne.s32.totalorder %s1150_s16, %s1146_s15 }
  0x12   : > { %p1264_p2 = scmp.eq.s32.totalorder %s822_s23, 0  ;;  %p140_p3 = scmp.ne.s32.totalorder %s1142_s14, %s1138_s13 }
  0x13   : > { %p141_p5 = scmp.eq.s32.totalorder %s822_s23, 3  ;;  %p146_p6 = scmp.ne.s32.totalorder %s1138_s13, %s1134_s12 }
  0x14   : > { %s1655_s26 = scalar_select %p1264_p2, 1, 0 }
  0x15   : > { %p1273_p4 = por %p1264_p2, %p85_p1  ;;  %p147_p7 = scmp.eq.s32.totalorder %s823_s24, 3 }
  0x16   : > { %p1279_p8 = por %p141_p5, %p140_p3  ;;  %p824_p9 = scmp.ge.s32.totalorder %s1174_s22, 1 }
  0x17   : > { %s1656_s28 = scalar_select %p1273_p4, 1, 0 }
  0x18   : > { %s1657_s29 = scalar_select %p1279_p8, 1, 0 }
  0x19   : > { %p1284_p10 = por %p147_p7, %p146_p6  ;;  %p154_p11 = scmp.lt.s32.totalorder %s1174_s22, 5 }
  0x1a   : > { %1658 = sst [smem:[#allocation16_spill]] %s1657_s29  ;;  %s42_s5 = sadd.s32 1, %s1170_s21 }
  0x1b   : > { %s1659_s30 = scalar_select %p1284_p10, 1, 0 }
  0x1c   : > { %p1289_p12 = pnand %p824_p9, %p154_p11  ;;  %s35_s7 = sadd.s32 1, %s1166_s20 }
  0x1d   : > { %1660 = sst [smem:[#allocation17_spill]] %s1659_s30  ;;  %p1303_p3 = scmp.ge.s32.totalorder %s35_s7, 2 }
  0x1e   : > { %p858_p13 = pneg %p1289_p12  ;;  %p80_p5 = scmp.eq.s32.totalorder %s1174_s22, 0 }
  0x1f   : > { %p874_p6 = scmp.lt.s32.totalorder %s1174_s22, 4  ;;  %s1664_s0 = sld [smem:[#allocation20_spill]] }
  0x20   : > { %p1298_p1 = pnand %p858_p13, %p1264_p2 }
  0x22   : > { %p973_p9 = pneg %p1298_p1 }
  0x25   : > { %s971_s11 = scalar_lea.hbm %s1664_s0, 16 }
  0x26   : > { %p972_p7 = scmp.ne.s32.totalorder %s1664_s0, %s971_s11  ;;  %p978_p0 = scmp.lt.u32.totalorder %s971_s11, %s1664_s0 }
  0x28   : > { %p974_p11 = pnand %p973_p9, %p972_p7 }
  0x2a   : > { %p975_p13 = pneg %p974_p11 }
  0x2c   : > { %p980_p10 = pnand %p978_p0, %p975_p13 }
  0x2e   : > { %983 = shalt.err (!%p980_p10)
}
  0x2f   : > { %s1176_s27 = smov [#allocation3]   ;;  %s1694_s7 = smov (%p1303_p3, %s35_s7), 0 }
  0x30   : > { %861 = dma.hbm_to_smem (!%p1298_p1), %s1664_s0, 16, %s1176_s27, [#allocation6]  }
  0x31   : > { %1665 = sst [smem:[#allocation18_spill]] %s1694_s7  ;;  %s1696_s5 = smov (!%p1303_p3, %s42_s5), %s1170_s21 }
  0x32   : > { %s68_s25 = ssub.s32 %s1166_s20, %s1694_s7  ;;  %p1666_p0 = scmp.ne.s32.totalorder %s1154_s17, %s1150_s16 }
  0x33   : > { %p44_p7 = scmp.ge.s32.totalorder %s1696_s5, 2  ;;  %s1344_s6 = sand.u32 1, %s1154_s17  }
  0x34   : > { %p1339_p10 = por %p80_p5, %p1666_p0  ;;  %s827_s27 = sshll.u32 %s1344_s6, 3 }
  0x35   : > { %s1698_s5 = smov (%p44_p7, %s1696_s5), 0  ;;  %s828_s8 = sshll.u32 %s1170_s21, 1 }
  0x36   : > { %1668 = sst [smem:[#allocation19_spill]] %s1698_s5  ;;  %s67_s10 = ssub.s32 %s1170_s21, %s1698_s5 }
  0x37   : > { %s185_s11 = sadd.s32 %s1166_s20, %s828_s8  ;;  %s69_s15 = sor.u32 %s68_s25, %s67_s10 }
  0x38   : > { %p128_p1 = scmp.eq.s32.totalorder %s67_s10, 0  ;;  %p70_p3 = scmp.eq.s32.totalorder %s69_s15, 0 }
  0x39   : > { %s829_s23 = sshll.u32 %s185_s11, 7  ;;  %s1669_s24 = sadd.s32 1, %s1142_s14 }
  0x3a   : > { %s1356_s9 = scalar_select %p128_p1, %s1142_s14, %s1669_s24  }
  0x3b   : > { %s1670_s0 = sadd.s32 1, %s1154_s17  ;;  %s1671_s1 = sld [smem:[#allocation21_spill]] }
  0x3c   : > { %s1361_s7 = scalar_select %p70_p3, %s1154_s17, %s1670_s0  }
  0x3d   : > { %s180_s8 = scalar_lea.vmem [#allocation7], %s827_s27  ;;  %p1374_p5 = pnand %p874_p6, %p1339_p10 }
  0x3e   : > { %s189_s25 = sshll.u32 %s180_s8, 4  ;;  %s830_s0 = sshll.u32 %s1344_s6, 7  ;;  %s1368_s25 = int_to_ptr.vmem [resolvable:$true] %s189_s25 }
  0x3f   : > { %s177_s3 = scalar_lea.sflag [#allocation4], %s1344_s6  ;;  %p986_p11 = pneg %p1374_p5 }
  0x41   : > { %s1366_s29 = scalar_lea.hbm %s1671_s1, %s829_s23  ;;  %s989_s30 = scalar_lea.hbm %s1671_s1, 512 }
  0x42   : > { %s984_s12 = scalar_lea.hbm %s1366_s29, 128  ;;  %p990_p6 = scmp.lt.u32.totalorder %s1366_s29, %s1671_s1 }
  0x43   : > { %p985_p9 = scmp.ne.s32.totalorder %s1366_s29, %s984_s12  ;;  %p991_p10 = scmp.lt.u32.totalorder %s989_s30, %s984_s12 }
  0x44   : > { %p993_p1 = scmp.lt.u32.totalorder %s984_s12, %s1366_s29 }
  0x45   : > { %p987_p13 = pnand %p986_p11, %p985_p9  ;;  %p992_p7 = por %p991_p10, %p990_p6 }
  0x47   : > { %p988_p0 = pneg %p987_p13  ;;  %p994_p3 = por %p993_p1, %p992_p7 }
  0x49   : > { %p995_p8 = pnand %p994_p3, %p988_p0 }
  0x4b   : > { %998 = shalt.err (!%p995_p8)
}
  0x4c   : > { %s999_s24 = scalar_lea.vmem %s1368_s25, 128  ;;  %s1177_s8 = smov [#allocation7]  }
  0x4d   : > { %p1000_p9 = scmp.ne.s32.totalorder %s1368_s25, %s999_s24  ;;  %s1004_s27 = sshll.u32 %s1177_s8, 4  ;;  %s1005_s27 = int_to_ptr.vmem [resolvable:$false] %s1004_s27 }
  0x4e   : > { %s1006_s11 = scalar_lea.vmem %s1005_s27, 256  ;;  %p1007_p2 = scmp.lt.s32.totalorder %s1368_s25, %s1005_s27 }
  0x4f   : > { %p1002_p13 = pnand %p1000_p9, %p986_p11  ;;  %p1008_p6 = scmp.lt.s32.totalorder %s1006_s11, %s999_s24 }
  0x51   : > { %p1003_p4 = pneg %p1002_p13  ;;  %p1009_p10 = por %p1008_p6, %p1007_p2 }
  0x53   : > { %p1010_p7 = pnand %p1009_p10, %p1003_p4 }
  0x55   : > { %1013 = shalt.err (!%p1010_p7)
}
  0x56   : > { %865 = dma.hbm_to_vmem [thread:$0]  (!%p1374_p5), %s1366_s29, 128, %s1368_s25, %s177_s3  }
  0x57   : > { %s847_s12 = sshll.u32 %s1170_s21, 5  ;;  %s200_s30 = scalar_lea.vmem [#allocation8], %s830_s0 }
  0x58   : > { %s212_s15 = sshll.u32 %s200_s30, 4  ;;  %s209_s23 = sadd.s32 %s1166_s20, %s847_s12  ;;  %s1409_s15 = int_to_ptr.vmem [resolvable:$true] %s212_s15 }
  0x59   : > { %s833_s24 = sshll.u32 %s209_s23, 7  ;;  %s197_s1 = scalar_lea.sflag [#allocation9], %s1344_s6 }
  0x5a   : > { %s1414_s11 = scalar_lea.hbm %s1638_s2, %s833_s24  ;;  %s1019_s0 = scalar_lea.hbm %s1638_s2, 8192 }
  0x5b   : > { %s1014_s5 = scalar_lea.hbm %s1414_s11, 2048  ;;  %p1020_p0 = scmp.lt.u32.totalorder %s1414_s11, %s1638_s2 }
  0x5c   : > { %p1015_p2 = scmp.ne.s32.totalorder %s1414_s11, %s1014_s5  ;;  %p1021_p1 = scmp.lt.u32.totalorder %s1019_s0, %s1014_s5 }
  0x5d   : > { %p1023_p9 = scmp.lt.u32.totalorder %s1014_s5, %s1414_s11 }
  0x5e   : > { %p1017_p4 = pnand %p1015_p2, %p986_p11  ;;  %p1022_p3 = por %p1021_p1, %p1020_p0 }
  0x60   : > { %p1018_p8 = pneg %p1017_p4  ;;  %p1024_p13 = por %p1023_p9, %p1022_p3 }
  0x62   : > { %p1025_p6 = pnand %p1024_p13, %p1018_p8 }
  0x64   : > { %1028 = shalt.err (!%p1025_p6)
}
  0x65   : > { %s1029_s30 = scalar_lea.vmem %s1409_s15, 2048  ;;  %s1178_s23 = smov [#allocation8]  }
  0x66   : > { %p1030_p10 = scmp.ne.s32.totalorder %s1409_s15, %s1029_s30  ;;  %s1034_s24 = sshll.u32 %s1178_s23, 4  ;;  %s1035_s24 = int_to_ptr.vmem [resolvable:$false] %s1034_s24 }
  0x67   : > { %s1036_s8 = scalar_lea.vmem %s1035_s24, 4096  ;;  %p1037_p4 = scmp.lt.s32.totalorder %s1409_s15, %s1035_s24 }
  0x68   : > { %p1032_p7 = pnand %p1030_p10, %p986_p11  ;;  %p1038_p0 = scmp.lt.s32.totalorder %s1036_s8, %s1029_s30 }
  0x6a   : > { %p1033_p2 = pneg %p1032_p7  ;;  %p1039_p1 = por %p1038_p0, %p1037_p4 }
  0x6c   : > { %p1040_p3 = pnand %p1039_p1, %p1033_p2 }
  0x6e   : > { %1043 = shalt.err (!%p1040_p3)
}
  0x6f   : > { %s1179_s5 = smov 256   ;;  %s1180_s27 = smov 128  }
  0x70   : > { %s1181_s29 = smov 8   ;;  %224 = sbr.rel (%p1289_p12) target bundleno = 376 (0x178), region = 32 }
  0x71   : > { %868 = dma.hbm_to_vmem [thread:$0]  (!%p1374_p5), %s1414_s11, 2048, %s1409_s15, %s197_s1, %s1179_s5, %s1180_s27, %s1181_s29  }
  0x72   : > { %p1673_p11 = scmp.ne.s32.totalorder (!%p1289_p12), %s1655_s26, 0 }
  0x77   : > { %1117 = dma.done.wait (%p1673_p11), [#allocation6], 16  }
  0x78   : > { %1119 = vsyncadd (%p1673_p11), [#allocation6], 4294967280  ;;  %s230_s25 = sand.u32 1, %s1150_s16   ;;  %p1674_p8 = scmp.ne.s32.totalorder %s1656_s28, 0 }
  0x79   : > { %s836_s0 = sshll.u32 %s230_s25, 3  ;;  %s231_s3 = scalar_lea.sflag [#allocation4], %s230_s25 }
  0x7a   : > { %s1449_s12 = scalar_lea.vmem [#allocation7], %s836_s0 }
  0x7b   : > { %1121 = dma.done.wait (%p1674_p8), %s231_s3, 128  }
  0x7c   : > { %1123 = vsyncadd (%p1674_p8), %s231_s3, 4294967168  ;;  %s837_s1 = sshll.u32 %s230_s25, 7  ;;  %s240_s4 = scalar_lea.sflag [#allocation9], %s230_s25 }
  0x7d   : > { %s1455_s6 = scalar_lea.vmem [#allocation8], %s837_s1 }
  0x7e   : > { %1125 = dma.done.wait (%p1674_p8), %s240_s4, 2048  }
  0x7f   : > { %1127 = vsyncadd (%p1674_p8), %s240_s4, 4294965248 }
  0x80   : > { %248 = sfence }
  0x81   : > { %s269_s26 = sand.u32 1, %s1138_s13   ;;  %p839_p12 = scmp.ne.s32.totalorder %s1158_s18, 0 }
  0x82   : > { %s1464_s10 = sshll.u32 %s269_s26, 3  ;;  %v1182_v0 = vmov (!%p839_p12), 0.0  }
  0x83   : > { %s271_s15 = scalar_lea.vmem [#allocation10], %s1464_s10  ;;  %277 = sbr.rel (%p839_p12) target bundleno = 139 (0x8b), region = 48  ;;  %278 = vst [vmem:[#allocation2] sm:$0xff] (!%p839_p12), %v1182_v0  ;;  %279 = vst [vmem:[#allocation2 + $0x8] sm:$0xff] (!%p839_p12), %v1182_v0 }
  0x84   : > { %280 = vst [vmem:[#allocation2 + $0x10] sm:$0xff] (!%p839_p12), %v1182_v0  ;;  %281 = vst [vmem:[#allocation2 + $0x18] sm:$0xff] (!%p839_p12), %v1182_v0 }
  0x85   : > { %282 = vst [vmem:[#allocation2 + $0x20] sm:$0xff] (!%p839_p12), %v1182_v0  ;;  %283 = vst [vmem:[#allocation2 + $0x28] sm:$0xff] (!%p839_p12), %v1182_v0 }
  0x86   : > { %284 = vst [vmem:[#allocation2 + $0x30] sm:$0xff] (!%p839_p12), %v1182_v0  ;;  %285 = vst [vmem:[#allocation2 + $0x38] sm:$0xff] (!%p839_p12), %v1182_v0 }
  0x87   : > { %286 = vst [vmem:[#allocation2 + $0x40] sm:$0xff] (!%p839_p12), %v1182_v0  ;;  %287 = vst [vmem:[#allocation2 + $0x48] sm:$0xff] (!%p839_p12), %v1182_v0 }
  0x88   : > { %288 = vst [vmem:[#allocation2 + $0x50] sm:$0xff] (!%p839_p12), %v1182_v0  ;;  %289 = vst [vmem:[#allocation2 + $0x58] sm:$0xff] (!%p839_p12), %v1182_v0 }
  0x89   : > { %290 = vst [vmem:[#allocation2 + $0x60] sm:$0xff] (!%p839_p12), %v1182_v0  ;;  %291 = vst [vmem:[#allocation2 + $0x68] sm:$0xff] (!%p839_p12), %v1182_v0 }
  0x8a   : > { %292 = vst [vmem:[#allocation2 + $0x70] sm:$0xff] %v1182_v0  ;;  %293 = vst [vmem:[#allocation2 + $0x78] sm:$0xff] %v1182_v0 }
  0x8b PF: > { %s294_s28 = sld [smem:[#allocation3]]  ;;  %v335_v1 = vlaneseq  ;;  %v1183_v2 = vmov 1966171168   ;;  %v295_v5 = vld [vmem:[%s1449_s12] sm:$0xff]  ;;  %v298_v16 = vld [vmem:[%s1455_s6] sm:$0xff]  ;;  %v299_v17 = vld [vmem:[%s1455_s6 + $0x8] sm:$0xff] }
  0x8c   : > { %v333_v3 = vunpack.c.l.s4 %v1183_v2  ;;  %v300_v22 = vld [vmem:[%s1455_s6 + $0x10] sm:$0xff]  ;;  %v301_v23 = vld [vmem:[%s1455_s6 + $0x18] sm:$0xff]  ;;  %v302_v28 = vld [vmem:[%s1455_s6 + $0x20] sm:$0xff]  ;;  %p840_p5 = scmp.ne.s32.totalorder %s1158_s18, 1 }
  0x8d   : > { %v1469_v4 = vshrl.u32 %v335_v1, 7  ;;  %v303_v30 = vld [vmem:[%s1455_s6 + $0x28] sm:$0xff]  ;;  %v306_v31 = vld [vmem:[%s1455_s6 + $0x40] sm:$0xff]  ;;  %v314_v32 = vld [vmem:[#allocation2] sm:$0xff]  ;;  %s841_s18 = sld [smem:[#allocation3 + $0x1]] (!%p840_p5)  ;;  %s842_s11 = sld [smem:[#allocation3 + $0x2]] (!%p840_p5) }
  0x8e   : > { %v334_v6 = vunpack.c.0.s8 %v333_v3  ;;  %v315_v33 = vld [vmem:[#allocation2 + $0x8] sm:$0xff]  ;;  %v304_v42 = vld [vmem:[%s1455_s6 + $0x30] sm:$0xff]  ;;  %v316_v44 = vld [vmem:[#allocation2 + $0x10] sm:$0xff]  ;;  %vm599_vm0 = vcmask (!%p840_p5), 130112   ;;  %vm664_vm1 = vcmask (!%p840_p5), 1041409   ;;  %vm666_vm2 = vcmask (!%p840_p5), 1042434  }
  0x8f   : > { %v1474_v11 = vsub.s32 0, %v1469_v4  ;;  %v305_v43 = vld [vmem:[%s1455_s6 + $0x38] sm:$0xff]  ;;  %v317_v45 = vld [vmem:[#allocation2 + $0x18] sm:$0xff]  ;;  %v318_v55 = vld [vmem:[#allocation2 + $0x20] sm:$0xff]  ;;  %vm668_vm3 = vcmask (!%p840_p5), 1043459   ;;  %vm670_vm4 = vcmask (!%p840_p5), 1044484  }
  0x90   : > { %v337_v8 = vsub.s32 %v334_v6, %v1469_v4  ;;  %v307_v50 = vld [vmem:[%s1455_s6 + $0x48] sm:$0xff]  ;;  %v319_v56 = vld [vmem:[#allocation2 + $0x28] sm:$0xff]  ;;  %v322_v61 = vld [vmem:[#allocation2 + $0x40] sm:$0xff]  ;;  %vm672_vm5 = vcmask (!%p840_p5), 1045509   ;;  %vm674_vm6 = vcmask (!%p840_p5), 1046534   ;;  %vm676_vm7 = vcmask (!%p840_p5), 1047559  }
  0x91   : > { %v296_v7 = vstv %s294_s28  ;;  %v320_v0 = vld [vmem:[#allocation2 + $0x30] sm:$0xff]  ;;  %v321_v2 = vld [vmem:[#allocation2 + $0x38] sm:$0xff]  ;;  %vm679_vm8 = vcmask (!%p840_p5), 130048  }
  0x92   : > { %v297_v9 = vsub.f32 %v295_v5, %v296_v7  ;;  %v323_v5 = vld [vmem:[#allocation2 + $0x48] sm:$0xff] }
  0x94   : > { %v338_v10 = vrot.slane %v297_v9, %v337_v8  ;;  %v331_v12 = vcombine.high %v297_v9, %v297_v9 }
  0x96   : > { %v354_v13 = vrot.slane %v338_v10, %v337_v8  ;;  %v346_v14 = vcombine.high %v338_v10, %v338_v10  ;;  %v345_v15 = vrot.slane %v331_v12, %v337_v8  ;;  %v308_v12 = vld [vmem:[%s1455_s6 + $0x50] sm:$0xff] }
  0x98   : > { %v383_v18 = vrot.slane %v354_v13, %v1474_v11  ;;  %v368_v19 = vrot.slane %v346_v14, %v337_v8  ;;  %v376_v20 = vcombine.high %v354_v13, %v354_v13  ;;  %v1479_v21 = vrot.slane %v345_v15, %v337_v8  ;;  %v309_v13 = vld [vmem:[%s1455_s6 + $0x58] sm:$0xff]  ;;  %v310_v14 = vld [vmem:[%s1455_s6 + $0x60] sm:$0xff] }
  0x99   : > { %v347_v24 = vcombine.high %v345_v15, %v345_v15 }
  0x9a   : > { %v420_v25 = vsub.f32 %v383_v18, %v298_v16  ;;  %v421_v26 = vsub.f32 %v383_v18, %v299_v17  ;;  %v387_v27 = vrot.slane %v368_v19, %v1474_v11  ;;  %v391_v29 = vrot.slane %v376_v20, %v1474_v11 }
  0x9b   : > { %v378_v34 = vcombine.high %v368_v19, %v368_v19  ;;  %v399_v35 = vrot.slane %v1479_v21, %v1474_v11  ;;  %v1490_v36 = vrot.slane %v347_v24, %v337_v8  ;;  %v377_v37 = vcombine.high %v1479_v21, %v1479_v21  ;;  %v311_v19 = vld [vmem:[%s1455_s6 + $0x68] sm:$0xff] }
  0x9c   : > { %v436_v38 = vmul.f32 %v420_v25, %v420_v25  ;;  %v437_v39 = vmul.f32 %v421_v26, %v421_v26  ;;  %v422_v40 = vsub.f32 %v387_v27, %v300_v22  ;;  %v423_v41 = vsub.f32 %v387_v27, %v301_v23  ;;  %v312_v27 = vld [vmem:[%s1455_s6 + $0x70] sm:$0xff] }
  0x9d   : > { %v424_v46 = vsub.f32 %v391_v29, %v302_v28  ;;  %v425_v47 = vsub.f32 %v391_v29, %v303_v30  ;;  %v395_v48 = vrot.slane %v378_v34, %v1474_v11  ;;  %v428_v49 = vsub.f32 %v399_v35, %v306_v31  ;;  %v313_v28 = vld [vmem:[%s1455_s6 + $0x78] sm:$0xff]  ;;  %v324_v29 = vld [vmem:[#allocation2 + $0x50] sm:$0xff]  ;;  %v325_v30 = vld [vmem:[#allocation2 + $0x58] sm:$0xff] }
  0x9e   : > { %v452_v51 = vadd.f32 %v436_v38, %v314_v32  ;;  %v453_v52 = vadd.f32 %v437_v39, %v315_v33  ;;  %v438_v53 = vmul.f32 %v422_v40, %v422_v40  ;;  %v439_v54 = vmul.f32 %v423_v41, %v423_v41  ;;  %v326_v31 = vld [vmem:[#allocation2 + $0x60] sm:$0xff] }
  0x9f   : > { %v440_v57 = vmul.f32 %v424_v46, %v424_v46  ;;  %v441_v58 = vmul.f32 %v425_v47, %v425_v47  ;;  %v426_v59 = vsub.f32 %v395_v48, %v304_v42  ;;  %v427_v60 = vsub.f32 %v395_v48, %v305_v43 }
  0xa0   : > { %468 = vst [vmem:[#allocation2] sm:$0xff] %v452_v51  ;;  %469 = vst [vmem:[#allocation2 + $0x8] sm:$0xff] %v453_v52  ;;  %v454_v62 = vadd.f32 %v438_v53, %v316_v44  ;;  %v455_v63 = vadd.f32 %v439_v54, %v317_v45  ;;  %v444_v3 = vmul.f32 %v428_v49, %v428_v49  ;;  %v328_v44 = vld [vmem:[#allocation2 + $0x70] sm:$0xff]  ;;  %v329_v45 = vld [vmem:[#allocation2 + $0x78] sm:$0xff] }
  0xa1   : > { %v429_v6 = vsub.f32 %v399_v35, %v307_v50  ;;  %v456_v7 = vadd.f32 %v440_v57, %v318_v55  ;;  %v457_v8 = vadd.f32 %v441_v58, %v319_v56  ;;  %v442_v9 = vmul.f32 %v426_v59, %v426_v59 }
  0xa2   : > { %v443_v10 = vmul.f32 %v427_v60, %v427_v60  ;;  %470 = vst [vmem:[#allocation2 + $0x10] sm:$0xff] %v454_v62  ;;  %471 = vst [vmem:[#allocation2 + $0x18] sm:$0xff] %v455_v63  ;;  %v460_v15 = vadd.f32 %v444_v3, %v322_v61  ;;  %v403_v17 = vrot.slane %v1490_v36, %v1474_v11 }
  0xa3   : > { %v445_v16 = vmul.f32 %v429_v6, %v429_v6  ;;  %v407_v18 = vrot.slane %v377_v37, %v1474_v11  ;;  %472 = vst [vmem:[#allocation2 + $0x20] sm:$0xff] %v456_v7  ;;  %473 = vst [vmem:[#allocation2 + $0x28] sm:$0xff] %v457_v8  ;;  %v458_v20 = vadd.f32 %v442_v9, %v320_v0 }
  0xa4   : > { %v459_v21 = vadd.f32 %v443_v10, %v321_v2  ;;  %v379_v22 = vcombine.high %v1490_v36, %v1490_v36  ;;  %476 = vst [vmem:[#allocation2 + $0x40] sm:$0xff] %v460_v15  ;;  %v430_v24 = vsub.f32 %v403_v17, %v308_v12  ;;  %v431_v25 = vsub.f32 %v403_v17, %v309_v13  ;;  %v327_v36 = vld [vmem:[#allocation2 + $0x68] sm:$0xff] }
  0xa5   : > { %v461_v23 = vadd.f32 %v445_v16, %v323_v5  ;;  %v432_v26 = vsub.f32 %v407_v18, %v310_v14  ;;  %474 = vst [vmem:[#allocation2 + $0x30] sm:$0xff] %v458_v20  ;;  %v433_v32 = vsub.f32 %v407_v18, %v311_v19  ;;  %v589_v10 = vand.u32 (!%p840_p5), 127, %v335_v1 }
  0xa6   : > { %475 = vst [vmem:[#allocation2 + $0x38] sm:$0xff] %v459_v21  ;;  %v411_v33 = vrot.slane %v379_v22, %v1474_v11  ;;  %v446_v34 = vmul.f32 %v430_v24, %v430_v24  ;;  %v447_v35 = vmul.f32 %v431_v25, %v431_v25  ;;  %v1512_v12 = vstv (!%p840_p5), %s841_s18 }
  0xa7   : > { %477 = vst [vmem:[#allocation2 + $0x48] sm:$0xff] %v461_v23  ;;  %v448_v37 = vmul.f32 %v432_v26, %v432_v26  ;;  %v449_v38 = vmul.f32 %v433_v32, %v433_v32  ;;  %v490_v51 = vld [vmem:[#allocation2] sm:$0xff] (!%p840_p5)  ;;  %v491_v53 = vld [vmem:[#allocation2 + $0x8] sm:$0xff] (!%p840_p5)  ;;  %v594_v15 = vadd.s32 (!%p840_p5), 4294967288, %v589_v10  ;;  %v1517_v19 = vstv (!%p840_p5), %s842_s11 }
  0xa8   : > { %v434_v39 = vsub.f32 %v411_v33, %v312_v27  ;;  %v435_v40 = vsub.f32 %v411_v33, %v313_v28  ;;  %v462_v41 = vadd.f32 %v446_v34, %v324_v29  ;;  %v463_v42 = vadd.f32 %v447_v35, %v325_v30  ;;  %487 = sbr.rel (%p840_p5) target bundleno = 349 (0x15d), region = 52  ;;  %506 = vadd.xlane.f32.xlu0 (!%p840_p5), %v490_v51 }
  0xa9   : > { %v464_v43 = vadd.f32 %v448_v37, %v326_v31  ;;  %v465_v46 = vadd.f32 %v449_v38, %v327_v36  ;;  %v492_v50 = vld [vmem:[#allocation2 + $0x10] sm:$0xff] (!%p840_p5)  ;;  %v493_v52 = vld [vmem:[#allocation2 + $0x18] sm:$0xff] (!%p840_p5)  ;;  %v1525_v26 = vsub.s32 (!%p840_p5), %v594_v15, %v1469_v4  ;;  %v592_v31 = vsub.s32 (!%p840_p5), %v589_v10, %v1469_v4 }
  0xaa   : > { %v450_v47 = vmul.f32 %v434_v39, %v434_v39  ;;  %v451_v48 = vmul.f32 %v435_v40, %v435_v40  ;;  %478 = vst [vmem:[#allocation2 + $0x50] sm:$0xff] %v462_v41  ;;  %479 = vst [vmem:[#allocation2 + $0x58] sm:$0xff] %v463_v42  ;;  %510 = vadd.xlane.f32.xlu1 (!%p840_p5), %v492_v50  ;;  %v495_v54 = vld [vmem:[#allocation2 + $0x28] sm:$0xff] (!%p840_p5)  ;;  %v494_v55 = vld [vmem:[#allocation2 + $0x20] sm:$0xff] (!%p840_p5) }
  0xab   : > { %480 = vst [vmem:[#allocation2 + $0x60] sm:$0xff] %v464_v43  ;;  %481 = vst [vmem:[#allocation2 + $0x68] sm:$0xff] %v465_v46  ;;  %v498_v59 = vld [vmem:[#allocation2 + $0x40] sm:$0xff] (!%p840_p5) }
  0xac   : > { %v466_v11 = vadd.f32 %v450_v47, %v328_v44  ;;  %v467_v49 = vadd.f32 %v451_v48, %v329_v45  ;;  %508 = vadd.xlane.f32.xlu0 (!%p840_p5), %v491_v53  ;;  %v496_v57 = vld [vmem:[#allocation2 + $0x30] sm:$0xff] (!%p840_p5) }
  0xad   : > { %v497_v56 = vld [vmem:[#allocation2 + $0x38] sm:$0xff] (!%p840_p5) }
  0xae   : > { %482 = vst [vmem:[#allocation2 + $0x70] sm:$0xff] %v466_v11  ;;  %483 = vst [vmem:[#allocation2 + $0x78] sm:$0xff] %v467_v49  ;;  %512 = vadd.xlane.f32.xlu1 (!%p840_p5), %v493_v52  ;;  %v499_v58 = vld [vmem:[#allocation2 + $0x48] sm:$0xff] (!%p840_p5) }
  0xb0   : > { %514 = vadd.xlane.f32.xlu0 %v494_v55 }
  0xb1   : > { %v501_v60 = vld [vmem:[#allocation2 + $0x58] sm:$0xff]  ;;  %v500_v61 = vld [vmem:[#allocation2 + $0x50] sm:$0xff] }
  0xb2   : > { %516 = vadd.xlane.f32.xlu1 %v495_v54  ;;  %v503_v62 = vld [vmem:[#allocation2 + $0x68] sm:$0xff]  ;;  %v502_v63 = vld [vmem:[#allocation2 + $0x60] sm:$0xff] }
  0xb4   : > { %518 = vadd.xlane.f32.xlu0 %v496_v57 }
  0xb5   : > { %v505_v0 = vld [vmem:[#allocation2 + $0x78] sm:$0xff]  ;;  %v504_v2 = vld [vmem:[#allocation2 + $0x70] sm:$0xff] }
  0xb6   : > { %520 = vadd.xlane.f32.xlu1 %v497_v56 }
  0xb8   : > { %522 = vadd.xlane.f32.xlu0 %v498_v59 }
  0xba   : > { %524 = vadd.xlane.f32.xlu1 %v499_v58 }
  0xbc   : > { %526 = vadd.xlane.f32.xlu0 %v500_v61 }
  0xbe   : > { %528 = vadd.xlane.f32.xlu1 %v501_v60 }
  0xc0   : > { %530 = vadd.xlane.f32.xlu0 %v502_v63 }
  0xc2   : > { %532 = vadd.xlane.f32.xlu1 %v503_v62 }
  0xc4   : > { %534 = vadd.xlane.f32.xlu0 %v504_v2 }
  0xc6   : > { %536 = vadd.xlane.f32.xlu1 %v505_v0 }
 0x135   : > { %v507_v5 = vpop.xlane.xlu0 %506 }
 0x136   : > { %v539_v20 = vmul.f32 %v1512_v12, %v507_v5 }
 0x137   : > { %v511_v3 = vpop.xlane.xlu1 %510 }
 0x138   : > { %v541_v18 = vmul.f32 %v1512_v12, %v511_v3  ;;  %v556_v33 = vsub.f32 %v1517_v19, %v539_v20 }
 0x139   : > { %v509_v7 = vpop.xlane.xlu0 %508 }
 0x13a   : > { %v540_v17 = vmul.f32 %v1512_v12, %v509_v7  ;;  %v558_v32 = vsub.f32 %v1517_v19, %v541_v18  ;;  %v593_v46 = vrot.slane %v556_v33, %v592_v31 }
 0x13b   : > { %v513_v6 = vpop.xlane.xlu1 %512 }
 0x13c   : > { %v542_v16 = vmul.f32 %v1512_v12, %v513_v6  ;;  %v557_v28 = vsub.f32 %v1517_v19, %v540_v17  ;;  %v604_v45 = vrot.slane %v558_v32, %v592_v31 }
 0x13d   : > { %v515_v9 = vpop.xlane.xlu0 %514 }
 0x13e   : > { %v543_v22 = vmul.f32 %v1512_v12, %v515_v9  ;;  %v559_v27 = vsub.f32 %v1517_v19, %v542_v16  ;;  %v598_v42 = vrot.slane %v557_v28, %v1525_v26 }
 0x13f   : > { %v517_v8 = vpop.xlane.xlu1 %516 }
 0x140   : > { %v544_v21 = vmul.f32 %v1512_v12, %v517_v8  ;;  %v560_v35 = vsub.f32 %v1517_v19, %v543_v22  ;;  %v608_v4 = vrot.slane %v559_v27, %v1525_v26  ;;  %v600_v57 = vsel %vm599_vm0, %v598_v42, %v593_v46 }
 0x141   : > { %v519_v14 = vpop.xlane.xlu0 %518 }
 0x142   : > { %v545_v23 = vmul.f32 %v1512_v12, %v519_v14  ;;  %v561_v34 = vsub.f32 %v1517_v19, %v544_v21  ;;  %v613_v49 = vrot.slane %v560_v35, %v592_v31  ;;  %v609_v56 = vsel %vm599_vm0, %v608_v4, %v604_v45 }
 0x143   : > { %v521_v13 = vpop.xlane.xlu1 %520  ;;  %v665_v10 = vsel %vm664_vm1, %v609_v56, %v600_v57 }
 0x144   : > { %v546_v1 = vmul.f32 %v1512_v12, %v521_v13  ;;  %v562_v36 = vsub.f32 %v1517_v19, %v545_v23  ;;  %v617_v11 = vrot.slane %v561_v34, %v1525_v26 }
 0x145   : > { %v523_v25 = vpop.xlane.xlu0 %522 }
 0x146   : > { %v547_v30 = vmul.f32 %v1512_v12, %v523_v25  ;;  %v563_v37 = vsub.f32 %v1517_v19, %v546_v1  ;;  %v622_v51 = vrot.slane %v562_v36, %v592_v31  ;;  %v618_v0 = vsel %vm599_vm0, %v617_v11, %v613_v49 }
 0x147   : > { %v525_v24 = vpop.xlane.xlu1 %524  ;;  %v667_v14 = vsel %vm666_vm2, %v618_v0, %v665_v10 }
 0x148   : > { %v548_v29 = vmul.f32 %v1512_v12, %v525_v24  ;;  %v564_v44 = vsub.f32 %v1517_v19, %v547_v30  ;;  %v626_v50 = vrot.slane %v563_v37, %v1525_v26 }
 0x149   : > { %v527_v39 = vpop.xlane.xlu0 %526 }
 0x14a   : > { %v549_v41 = vmul.f32 %v1512_v12, %v527_v39  ;;  %v565_v43 = vsub.f32 %v1517_v19, %v548_v29  ;;  %v631_v59 = vrot.slane %v564_v44, %v592_v31  ;;  %v627_v2 = vsel %vm599_vm0, %v626_v50, %v622_v51 }
 0x14b   : > { %v529_v38 = vpop.xlane.xlu1 %528  ;;  %v669_v18 = vsel %vm668_vm3, %v627_v2, %v667_v14 }
 0x14c   : > { %v550_v40 = vmul.f32 %v1512_v12, %v529_v38  ;;  %v566_v48 = vsub.f32 %v1517_v19, %v549_v41  ;;  %v635_v58 = vrot.slane %v565_v43, %v1525_v26 }
 0x14d   : > { %v531_v53 = vpop.xlane.xlu0 %530 }
 0x14e   : > { %v567_v47 = vsub.f32 %v1517_v19, %v550_v40  ;;  %v551_v55 = vmul.f32 %v1512_v12, %v531_v53  ;;  %v640_v61 = vrot.slane %v566_v48, %v592_v31  ;;  %v636_v13 = vsel %vm599_vm0, %v635_v58, %v631_v59 }
 0x14f   : > { %v533_v52 = vpop.xlane.xlu1 %532 }
 0x150   : > { %v552_v54 = vmul.f32 %v1512_v12, %v533_v52  ;;  %v644_v60 = vrot.slane %v567_v47, %v1525_v26  ;;  %v568_v63 = vsub.f32 %v1517_v19, %v551_v55 }
 0x151   : > { %v535_v5 = vpop.xlane.xlu0 %534 }
 0x152   : > { %v569_v62 = vsub.f32 %v1517_v19, %v552_v54  ;;  %v649_v7 = vrot.slane %v568_v63, %v592_v31  ;;  %v553_v9 = vmul.f32 %v1512_v12, %v535_v5  ;;  %v645_v15 = vsel %vm599_vm0, %v644_v60, %v640_v61 }
 0x153   : > { %v537_v3 = vpop.xlane.xlu1 %536 }
 0x154   : > { %v653_v6 = vrot.slane %v569_v62, %v1525_v26  ;;  %v554_v8 = vmul.f32 %v1512_v12, %v537_v3  ;;  %v570_v17 = vsub.f32 %v1517_v19, %v553_v9  ;;  %v671_v12 = vsel %vm670_vm4, %v636_v13, %v669_v18 }
 0x155   : > { %v673_v1 = vsel %vm672_vm5, %v645_v15, %v671_v12 }
 0x156   : > { %v571_v16 = vsub.f32 %v1517_v19, %v554_v8  ;;  %v654_v20 = vsel %vm599_vm0, %v653_v6, %v649_v7  ;;  %v658_v22 = vrot.slane %v570_v17, %v592_v31 }
 0x157   : > { %v675_v23 = vsel %vm674_vm6, %v654_v20, %v673_v1 }
 0x158   : > { %v662_v21 = vrot.slane %v571_v16, %v1525_v26 }
 0x15a   : > { %v663_v24 = vsel %vm599_vm0, %v662_v21, %v658_v22 }
 0x15b   : > { %v677_v25 = vsel %vm676_vm7, %v663_v24, %v675_v23 }
 0x15c   : > { %680 = vst.msk [vmem:[%s271_s15] sm:$0xff] %vm679_vm8, %v677_v25 }
 0x15d PF: > { %s1675_s30 = sld [smem:[#allocation16_spill]]  ;;  %s844_s23 = sshll.u32 %s1162_s19, 7 }
 0x15e   : > { %s1676_s5 = sld [smem:[#allocation22_spill]]  ;;  %s696_s29 = sshll.u32 %s271_s15, 4  ;;  %s697_s29 = int_to_ptr.vmem [resolvable:$true] %s696_s29 }
 0x15f   : > { %s682_s25 = scalar_lea.sflag [#allocation5], %s269_s26  ;;  %s1044_s0 = scalar_lea.vmem %s697_s29, 128 }
 0x160   : > { %p1045_p9 = scmp.ne.s32.totalorder %s697_s29, %s1044_s0  ;;  %s1184_s3 = smov [#allocation10]  }
 0x161   : > { %s1048_s12 = sshll.u32 %s1184_s3, 4  ;;  %s1049_s12 = int_to_ptr.vmem [resolvable:$false] %s1048_s12 }
 0x162   : > { %s1050_s1 = scalar_lea.vmem %s1049_s12, 256  ;;  %p1051_p7 = scmp.lt.s32.totalorder %s697_s29, %s1049_s12 }
 0x163   : > { %p1677_p13 = scmp.ne.s32.totalorder %s1675_s30, 0  ;;  %p1052_p2 = scmp.lt.s32.totalorder %s1050_s1, %s1044_s0 }
 0x164   : > { %s1576_s27 = scalar_lea.hbm %s1676_s5, %s844_s23 }
 0x165   : > { %p1046_p6 = pnand %p1045_p9, %p1677_p13  ;;  %p1053_p4 = por %p1052_p2, %p1051_p7 }
 0x167   : > { %p1047_p10 = pneg %p1046_p6 }
 0x169   : > { %p1054_p0 = pnand %p1053_p4, %p1047_p10 }
 0x16b   : > { %1057 = shalt.err (!%p1054_p0)
}
 0x16c   : > { %s1058_s19 = scalar_lea.hbm %s1576_s27, 128  ;;  %s1062_s26 = scalar_lea.hbm %s1676_s5, 256 }
 0x16d   : > { %p1059_p1 = scmp.ne.s32.totalorder %s1576_s27, %s1058_s19  ;;  %p1063_p8 = scmp.lt.u32.totalorder %s1576_s27, %s1676_s5 }
 0x16e   : > { %p1064_p12 = scmp.lt.u32.totalorder %s1062_s26, %s1058_s19  ;;  %p1066_p9 = scmp.lt.u32.totalorder %s1058_s19, %s1576_s27 }
 0x16f   : > { %p1060_p3 = pnand %p1059_p1, %p1677_p13 }
 0x170   : > { %p1065_p5 = por %p1064_p12, %p1063_p8 }
 0x171   : > { %p1061_p11 = pneg %p1060_p3 }
 0x172   : > { %p1067_p6 = por %p1066_p9, %p1065_p5 }
 0x174   : > { %p1068_p10 = pnand %p1067_p6, %p1061_p11 }
 0x176   : > { %1071 = shalt.err (!%p1068_p10)
}
 0x177   : > { %856 = dma.vmem_to_hbm [thread:$0]  (%p1677_p13), %s697_s29, 128, %s1576_s27, %s682_s25  }
 0x178 PF: > { %s1678_s28 = sld [smem:[#allocation15_spill]]  ;;  %s1679_s18 = sld [smem:[#allocation17_spill]] }
 0x179   : > { %p876_p7 = scmp.ge.s32.totalorder %s1174_s22, 2 }
 0x17e   : > { %s708_s11 = sand.u32 1, %s1678_s28   ;;  %p1680_p2 = scmp.ne.s32.totalorder %s1679_s18, 0 }
 0x17f   : > { %s709_s23 = scalar_lea.sflag [#allocation5], %s708_s11 }
 0x180   : > { %p870_p4 = pnand %p876_p7, %p1680_p2 }
 0x182   : > { %1129 = dma.done.wait (!%p870_p4), %s709_s23, 128  }
 0x183   : > { %1131 = vsyncadd (!%p870_p4), %s709_s23, 4294967168  ;;  %s23_s22 = sadd.s32 1, %s1174_s22   ;;  %s1681_s30 = sld [smem:[#allocation18_spill]] }
 0x184   : > { %p20_p0 = scmp.ge.s32.totalorder %s23_s22, 6   ;;  %s1682_s24 = sld [smem:[#allocation19_spill]] }
 0x185   : > { %s1683_s12 = smov %s1138_s13  ;;  %s1684_s13 = smov %s1142_s14 }
 0x186   : > { %s1685_s14 = smov %s1356_s9  ;;  %s1686_s15 = smov %s1150_s16 }
 0x187   : > { %s1687_s16 = smov %s1154_s17  ;;  %s1688_s17 = smov %s1361_s7 }
 0x188   : > { %s1689_s18 = smov %s1166_s20  ;;  %s1690_s19 = smov %s1170_s21 }
 0x189   : > { %s1691_s20 = smov %s1681_s30  ;;  %22 = sbr.rel (!%p20_p0) target bundleno = 16 (0x10), region = 103 }
 0x18a   : > { %s1692_s21 = smov %s1682_s24 }
 0x190   :  { %714 = vsyncpa [#allocation4], 1 }
 0x191   :  { %716 = vsyncpa [#allocation4 + $0x1], 1 }
 0x192   :  { %717 = vsyncpa [#allocation9], 1 }
 0x193   :  { %719 = vsyncpa [#allocation9 + $0x1], 1 }
 0x194   :  { %720 = vsyncpa [#allocation5], 1 }
 0x195   :  { %722 = vsyncpa [#allocation5 + $0x1], 1 }
 0x196   :  { %723 = vsyncpa [#allocation6], 1 }
 0x197   :  { %725 = vsyncpa [#allocation6 + $0x1], 1 }

</bundles_post_ra>
